<compile_context>
chip_gen: v6e
topology: v6e:2x2x1
jax: 0.10.0
libtpu: 0.0.40
codegen_flags: <defaults>
</compile_context>

<pallas_src>
import jax
import jax.numpy as jnp
from jax.experimental import pallas as pl
from jax.experimental.pallas import tpu as pltpu

_LANE = 128
_VMEM_WORKING_SET_BYTES = 32 * 1024 * 1024  # target for double-buffered in+out blocks
_VMEM_LIMIT_BYTES = 48 * 1024 * 1024        # explicit scoped-VMEM limit (fits v7x's 64 MiB)
_MXU_MIN_CIN = 16                           # below this, use the VPU broadcast-FMA path
_MAX_TILE_M = 32768                         # lane-tile cap


def _round_down_lane(n):
    return max(_LANE, (int(n) // _LANE) * _LANE)


def _round_up_lane(n):
    return max(_LANE, pl.cdiv(int(n), _LANE) * _LANE)


def _pick_tile_m(M, batch, c_in, c_out, itemsize, tile_m=None):
    """Largest 128-multiple lane tile whose double-buffered in+out blocks fit the
    VMEM working-set budget, clamped to cover M, then split (if needed) so the
    parallel grid has >= 2 blocks for v7x's two TensorCores."""
    per_lane = 2 * (c_in + c_out) * itemsize           # double-buffered input + output
    budget_tile = _round_down_lane(_VMEM_WORKING_SET_BYTES // max(per_lane, 1))
    cap = _MAX_TILE_M if tile_m is None else _round_down_lane(tile_m)
    t = min(cap, budget_tile, _round_up_lane(M))
    if batch * pl.cdiv(M, t) < 2 and M > _LANE:        # keep both TCs busy on v7x
        t = _round_up_lane(pl.cdiv(M, 2))
    return t


def _align_conv_kernel_mxu(x_ref, w_ref, b_ref, o_ref):
    # x_ref: (1, C_in, tile_m)   activations, spatial on lanes (native dtype)
    # w_ref: (C_out, C_in)       1x1-conv weight (resident)
    # b_ref: (C_out, 1)          bias (f32)
    # o_ref: (1, C_out, tile_m)  output, lane-dense store
    x = x_ref[0]                                   # keep native dtype (bf16 feeds MXU directly)
    w = w_ref[...].astype(x.dtype)
    acc = jnp.dot(w, x, preferred_element_type=jnp.float32)   # MXU; K = C_in
    acc = acc + b_ref[...].astype(jnp.float32)
    o_ref[0] = acc.astype(o_ref.dtype)


def _align_conv_kernel_vpu(x_ref, w_ref, b_ref, o_ref):
    # Tiny-channel path (C_in < 16): unrolled broadcast-FMA on the VPU.
    x = x_ref[0].astype(jnp.float32)               # (C_in, tile_m)
    w = w_ref[...].astype(jnp.float32)             # (C_out, C_in)
    b = b_ref[...].astype(jnp.float32)             # (C_out, 1)
    c_out, c_in = w.shape
    acc = jnp.broadcast_to(b, (c_out, x.shape[1]))
    for c in range(c_in):                          # unrolled; c_in is tiny here
        acc = acc + w[:, c:c + 1] * x[c:c + 1, :]
    o_ref[0] = acc.astype(o_ref.dtype)


def _align_conv_1x1(x_nchw, weight, bias, *, tile_m=None):
    """1x1 conv == per-pixel channel contraction, spatial axis kept on lanes."""
    B, C_in, T, N = x_nchw.shape
    C_out = weight.shape[0]
    M = T * N

    # Free (layout-preserving) reshapes only -- no transposes, no padding copies.
    x3 = x_nchw.reshape(B, C_in, M)
    w = weight.reshape(C_out, C_in)                # PyTorch weight is (C_out, C_in, 1, 1)
    b = bias.reshape(C_out, 1).astype(jnp.float32)

    itemsize = jnp.dtype(x_nchw.dtype).itemsize
    tm = _pick_tile_m(M, B, C_in, C_out, itemsize, tile_m)
    grid = (B, pl.cdiv(M, tm))                     # ragged M tail masked by Pallas

    kernel = _align_conv_kernel_mxu if C_in >= _MXU_MIN_CIN else _align_conv_kernel_vpu

    out3 = pl.pallas_call(
        kernel,
        out_shape=jax.ShapeDtypeStruct((B, C_out, M), x_nchw.dtype),
        grid_spec=pltpu.PrefetchScalarGridSpec(
            num_scalar_prefetch=0,
            grid=grid,
            in_specs=[
                pl.BlockSpec((1, C_in, tm), lambda bi, mi: (bi, 0, mi)),
                pl.BlockSpec((C_out, C_in), lambda bi, mi: (0, 0)),
                pl.BlockSpec((C_out, 1), lambda bi, mi: (0, 0)),
            ],
            out_specs=pl.BlockSpec((1, C_out, tm), lambda bi, mi: (bi, 0, mi)),
        ),
        compiler_params=pltpu.CompilerParams(
            dimension_semantics=("parallel", "parallel"),
            vmem_limit_bytes=_VMEM_LIMIT_BYTES),
    )(x3, w, b)

    # Free reshape back to NCHW (layout unchanged).
    return out3.reshape(B, C_out, T, N)


def align_forward(x_nchw, c_in, c_out, weight, bias):
    """Forward pass of Align, matching the PyTorch module exactly."""
    assert x_nchw.shape[1] == c_in
    if c_in > c_out:
        return _align_conv_1x1(x_nchw, weight, bias)
    elif c_in < c_out:
        # Single-pass zero-pad (read c_in channels, write c_out channels) -- no
        # separately materialized zeros tensor as with concatenate.
        # TODO(synk): ideally fuse this pad into Align's consumer to avoid the HBM round trip.
        return jnp.pad(x_nchw, ((0, 0), (0, c_out - c_in), (0, 0), (0, 0)))
    else:
        return x_nchw


def _init_align_params(key, c_in, c_out):
    """Deterministic Conv2d(c_in, c_out, (1,1)) params (PyTorch-style uniform fan-in init)."""
    kw, kb = jax.random.split(key)
    fan_in = c_in  # kernel_size = 1x1
    bound = 1.0 / (fan_in ** 0.5)
    weight = jax.random.uniform(kw, (c_out, c_in, 1, 1), jnp.float32, -bound, bound)
    bias = jax.random.uniform(kb, (c_out,), jnp.float32, -bound, bound)
    return weight, bias


if __name__ == "__main__":
    key = jax.random.PRNGKey(0)
    k_x, k_p, k_x2, k_p2 = jax.random.split(key, 4)

    # --- c_in > c_out, tiny channels (VPU broadcast-FMA path) ---
    B, C_IN, C_OUT, T, N = 2, 8, 4, 16, 16
    x = jax.random.normal(k_x, (B, C_IN, T, N), dtype=jnp.float32)
    weight, bias = _init_align_params(k_p, C_IN, C_OUT)
    out = jax.block_until_ready(align_forward(x, C_IN, C_OUT, weight, bias))
    ref = (jnp.einsum("bctn,oc->botn", x, weight.reshape(C_OUT, C_IN))
           + bias.reshape(1, C_OUT, 1, 1))
    assert out.shape == (B, C_OUT, T, N)
    assert jnp.allclose(out, ref, atol=1e-5, rtol=1e-5)

    # --- c_in > c_out, realistic channels (MXU dot path) ---
    B2, C_IN2, C_OUT2, T2, N2 = 2, 32, 16, 8, 16
    x2 = jax.random.normal(k_x2, (B2, C_IN2, T2, N2), dtype=jnp.float32)
    w2, b2 = _init_align_params(k_p2, C_IN2, C_OUT2)
    out2 = jax.block_until_ready(align_forward(x2, C_IN2, C_OUT2, w2, b2))
    ref2 = (jnp.einsum("bctn,oc->botn", x2, w2.reshape(C_OUT2, C_IN2))
            + b2.reshape(1, C_OUT2, 1, 1))
    assert out2.shape == (B2, C_OUT2, T2, N2)
    # Slightly loose tolerance: MXU may use reduced-precision passes for f32 matmul.
    assert jnp.allclose(out2, ref2, atol=5e-3, rtol=5e-3)

    # --- c_in < c_out: zero-pad branch (pure data movement, no kernel) ---
    wp, bp = _init_align_params(k_p, 4, 8)
    x_small = x[:, :4]
    out_pad = jax.block_until_ready(align_forward(x_small, 4, 8, wp, bp))
    assert out_pad.shape == (B, 8, T, N)
    assert jnp.allclose(out_pad[:, :4], x_small) and jnp.all(out_pad[:, 4:] == 0)

    # --- c_in == c_out: identity branch ---
    wi, bi_ = _init_align_params(k_p, 4, 4)
    out_id = jax.block_until_ready(align_forward(x_small, 4, 4, wi, bi_))
    assert jnp.allclose(out_id, x_small)

    print("KERNEL_OK")
</pallas_src>

<mosaic_0001>
module attributes {stable_mosaic.version = 11 : i64} {
  func.func @_align_conv_kernel_vpu(%arg0: i32, %arg1: i32, %arg2: memref<1x8x256xf32, #tpu.memory_space<vmem>>, %arg3: memref<4x8xf32, #tpu.memory_space<vmem>>, %arg4: memref<4x1xf32, #tpu.memory_space<vmem>>, %arg5: memref<1x4x256xf32, #tpu.memory_space<vmem>>) attributes {dimension_semantics = [#tpu.dimension_semantics<parallel>, #tpu.dimension_semantics<parallel>], iteration_bounds = array<i64: 2, 1>, scalar_prefetch = 0 : i64, scratch_operands = 0 : i64, tpu.core_type = #tpu.core_type<tc>, window_params = [{transform_indices = @transform_0, window_bounds = array<i64: 1, 8, 256>}, {pipeline_mode = #tpu.pipeline_mode<synchronous>, transform_indices = @transform_1, window_bounds = array<i64: 4, 8>}, {pipeline_mode = #tpu.pipeline_mode<synchronous>, transform_indices = @transform_2, window_bounds = array<i64: 4, 1>}, {transform_indices = @transform_3, window_bounds = array<i64: 1, 4, 256>}]} {
    %c0 = arith.constant 0 : index
    %c0_0 = arith.constant 0 : index
    %c0_1 = arith.constant 0 : index
    %0 = vector.load %arg2[%c0, %c0_0, %c0_1] : memref<1x8x256xf32, #tpu.memory_space<vmem>>, vector<1x8x256xf32>
    %1 = vector.shape_cast %0 : vector<1x8x256xf32> to vector<8x256xf32>
    %c0_2 = arith.constant 0 : index
    %c0_3 = arith.constant 0 : index
    %2 = vector.load %arg3[%c0_2, %c0_3] : memref<4x8xf32, #tpu.memory_space<vmem>>, vector<4x8xf32>
    %c0_4 = arith.constant 0 : index
    %c0_5 = arith.constant 0 : index
    %3 = vector.load %arg4[%c0_4, %c0_5] : memref<4x1xf32, #tpu.memory_space<vmem>>, vector<4x1xf32>
    %4 = vector.shape_cast %3 : vector<4x1xf32> to vector<4x1xf32>
    %5 = vector.broadcast %4 : vector<4x1xf32> to vector<4x256xf32>
    %6 = vector.extract_strided_slice %2 {offsets = [0, 0], sizes = [4, 1], strides = [1, 1]} : vector<4x8xf32> to vector<4x1xf32>
    %7 = vector.extract_strided_slice %1 {offsets = [0, 0], sizes = [1, 256], strides = [1, 1]} : vector<8x256xf32> to vector<1x256xf32>
    %8 = vector.broadcast %6 : vector<4x1xf32> to vector<4x256xf32>
    %9 = vector.broadcast %7 : vector<1x256xf32> to vector<4x256xf32>
    %10 = arith.mulf %8, %9 : vector<4x256xf32>
    %11 = arith.addf %5, %10 : vector<4x256xf32>
    %12 = vector.extract_strided_slice %2 {offsets = [0, 1], sizes = [4, 1], strides = [1, 1]} : vector<4x8xf32> to vector<4x1xf32>
    %13 = vector.extract_strided_slice %1 {offsets = [1, 0], sizes = [1, 256], strides = [1, 1]} : vector<8x256xf32> to vector<1x256xf32>
    %14 = vector.broadcast %12 : vector<4x1xf32> to vector<4x256xf32>
    %15 = vector.broadcast %13 : vector<1x256xf32> to vector<4x256xf32>
    %16 = arith.mulf %14, %15 : vector<4x256xf32>
    %17 = arith.addf %11, %16 : vector<4x256xf32>
    %18 = vector.extract_strided_slice %2 {offsets = [0, 2], sizes = [4, 1], strides = [1, 1]} : vector<4x8xf32> to vector<4x1xf32>
    %19 = vector.extract_strided_slice %1 {offsets = [2, 0], sizes = [1, 256], strides = [1, 1]} : vector<8x256xf32> to vector<1x256xf32>
    %20 = vector.broadcast %18 : vector<4x1xf32> to vector<4x256xf32>
    %21 = vector.broadcast %19 : vector<1x256xf32> to vector<4x256xf32>
    %22 = arith.mulf %20, %21 : vector<4x256xf32>
    %23 = arith.addf %17, %22 : vector<4x256xf32>
    %24 = vector.extract_strided_slice %2 {offsets = [0, 3], sizes = [4, 1], strides = [1, 1]} : vector<4x8xf32> to vector<4x1xf32>
    %25 = vector.extract_strided_slice %1 {offsets = [3, 0], sizes = [1, 256], strides = [1, 1]} : vector<8x256xf32> to vector<1x256xf32>
    %26 = vector.broadcast %24 : vector<4x1xf32> to vector<4x256xf32>
    %27 = vector.broadcast %25 : vector<1x256xf32> to vector<4x256xf32>
    %28 = arith.mulf %26, %27 : vector<4x256xf32>
    %29 = arith.addf %23, %28 : vector<4x256xf32>
    %30 = vector.extract_strided_slice %2 {offsets = [0, 4], sizes = [4, 1], strides = [1, 1]} : vector<4x8xf32> to vector<4x1xf32>
    %31 = vector.extract_strided_slice %1 {offsets = [4, 0], sizes = [1, 256], strides = [1, 1]} : vector<8x256xf32> to vector<1x256xf32>
    %32 = vector.broadcast %30 : vector<4x1xf32> to vector<4x256xf32>
    %33 = vector.broadcast %31 : vector<1x256xf32> to vector<4x256xf32>
    %34 = arith.mulf %32, %33 : vector<4x256xf32>
    %35 = arith.addf %29, %34 : vector<4x256xf32>
    %36 = vector.extract_strided_slice %2 {offsets = [0, 5], sizes = [4, 1], strides = [1, 1]} : vector<4x8xf32> to vector<4x1xf32>
    %37 = vector.extract_strided_slice %1 {offsets = [5, 0], sizes = [1, 256], strides = [1, 1]} : vector<8x256xf32> to vector<1x256xf32>
    %38 = vector.broadcast %36 : vector<4x1xf32> to vector<4x256xf32>
    %39 = vector.broadcast %37 : vector<1x256xf32> to vector<4x256xf32>
    %40 = arith.mulf %38, %39 : vector<4x256xf32>
    %41 = arith.addf %35, %40 : vector<4x256xf32>
    %42 = vector.extract_strided_slice %2 {offsets = [0, 6], sizes = [4, 1], strides = [1, 1]} : vector<4x8xf32> to vector<4x1xf32>
    %43 = vector.extract_strided_slice %1 {offsets = [6, 0], sizes = [1, 256], strides = [1, 1]} : vector<8x256xf32> to vector<1x256xf32>
    %44 = vector.broadcast %42 : vector<4x1xf32> to vector<4x256xf32>
    %45 = vector.broadcast %43 : vector<1x256xf32> to vector<4x256xf32>
    %46 = arith.mulf %44, %45 : vector<4x256xf32>
    %47 = arith.addf %41, %46 : vector<4x256xf32>
    %48 = vector.extract_strided_slice %2 {offsets = [0, 7], sizes = [4, 1], strides = [1, 1]} : vector<4x8xf32> to vector<4x1xf32>
    %49 = vector.extract_strided_slice %1 {offsets = [7, 0], sizes = [1, 256], strides = [1, 1]} : vector<8x256xf32> to vector<1x256xf32>
    %50 = vector.broadcast %48 : vector<4x1xf32> to vector<4x256xf32>
    %51 = vector.broadcast %49 : vector<1x256xf32> to vector<4x256xf32>
    %52 = arith.mulf %50, %51 : vector<4x256xf32>
    %53 = arith.addf %47, %52 : vector<4x256xf32>
    %c0_6 = arith.constant 0 : index
    %c0_7 = arith.constant 0 : index
    %c0_8 = arith.constant 0 : index
    %54 = vector.load %arg5[%c0_6, %c0_7, %c0_8] : memref<1x4x256xf32, #tpu.memory_space<vmem>>, vector<1x4x256xf32>
    %55 = vector.shape_cast %54 : vector<1x4x256xf32> to vector<4x256xf32>
    %56 = vector.shape_cast %53 : vector<4x256xf32> to vector<1x4x256xf32>
    tpu.vector_store %arg5[%c0_6, %c0_7, %c0_8], %56 {strides = array<i32>} : memref<1x4x256xf32, #tpu.memory_space<vmem>>, vector<1x4x256xf32>,
    return
  }
  func.func @transform_0(%arg0: i32, %arg1: i32) -> (i32, i32, i32) {
    %c0_i32 = arith.constant 0 : i32
    %c0_i32_0 = arith.constant 0 : i32
    return %arg0, %c0_i32, %arg1 : i32, i32, i32
  }
  func.func @transform_1(%arg0: i32, %arg1: i32) -> (i32, i32) {
    %c0_i32 = arith.constant 0 : i32
    %c0_i32_0 = arith.constant 0 : i32
    %c0_i32_1 = arith.constant 0 : i32
    return %c0_i32, %c0_i32_0 : i32, i32
  }
  func.func @transform_2(%arg0: i32, %arg1: i32) -> (i32, i32) {
    %c0_i32 = arith.constant 0 : i32
    %c0_i32_0 = arith.constant 0 : i32
    %c0_i32_1 = arith.constant 0 : i32
    return %c0_i32, %c0_i32_0 : i32, i32
  }
  func.func @transform_3(%arg0: i32, %arg1: i32) -> (i32, i32, i32) {
    %c0_i32 = arith.constant 0 : i32
    %c0_i32_0 = arith.constant 0 : i32
    return %arg0, %c0_i32, %arg1 : i32, i32, i32
  }
}

</mosaic_0001>

<bundles_post_ra>
// kernel: tpu_custom_call.1
= control target key start
LH: loop header
LB: loop body
LE: loop exit
PB: predicated region body
PF: predicated region fallthrough
CT: control target
= control target key end

     0   :  { %8 = vsyncpa [#allocation3], 0  ;;  %s832_s0 = inlined_call_operand.hbm [shape: f32[2,8,256], index: 0, kind: input, shape index: {}]   ;;  %s833_s1 = inlined_call_operand.vmem [shape: f32[4,8], index: 1, kind: input, shape index: {}]   ;;  %s834_s2 = inlined_call_operand.vmem [shape: f32[4,1], index: 2, kind: input, shape index: {}]   ;;  %s835_s3 = inlined_call_operand.hbm [shape: f32[2,4,256], index: 3, kind: output, shape index: {}]  }
   0x1   :  { %10 = vsyncpa [#allocation3 + $0x1], 0 }
   0x2   :  { %11 = vsyncpa [#allocation4], 0 }
   0x3   :  { %13 = vsyncpa [#allocation4 + $0x1], 0  ;;  %s687_s12 = smov 0   ;;  %s689_s13 = smov 0  }
   0x4   :  { %s691_s14 = smov 0   ;;  %s693_s15 = smov 0  }
   0x5   :  { %s695_s16 = smov 0   ;;  %s697_s17 = smov 0  }
   0x6 LB: > { %s451_s18 = sadd.s32 4294967295, %s655_s17   ;;  %s452_s19 = sadd.s32 4294967294, %s655_s17   ;;  %s655_s17 = sphi %s697_s17, %s19_s17   ;;  %s651_s16 = sphi %s695_s16, %s847_s16   ;;  %s647_s15 = sphi %s693_s15, %s846_s15   ;;  %s643_s14 = sphi %s691_s14, %s845_s14   ;;  %s639_s13 = sphi %s689_s13, %s844_s13   ;;  %s635_s12 = sphi %s687_s12, %s843_s12  }
   0x7   : > { %s31_s20 = sadd.s32 1, %s651_s16  ;;  %s40_s21 = sadd.s32 1, %s643_s14 }
   0x8   : > { %p33_p0 = scmp.ge.s32.totalorder %s31_s20, 2  ;;  %p47_p1 = scmp.ne.s32.totalorder %s643_s14, %s639_s13 }
   0x9   : > { %p48_p2 = scmp.eq.s32.totalorder %s655_s17, 0  ;;  %p53_p3 = scmp.ne.s32.totalorder %s639_s13, %s635_s12 }
   0xa   : > { %s849_s20 = smov (%p33_p0, %s31_s20), 0  ;;  %p54_p5 = scmp.eq.s32.totalorder %s451_s18, 0 }
   0xb   : > { %p728_p4 = por %p48_p2, %p47_p1  ;;  %s35_s23 = ssub.s32 %s651_s16, %s849_s20 }
   0xc   : > { %p121_p6 = scmp.eq.s32.totalorder %s451_s18, 1  ;;  %p38_p7 = scmp.eq.s32.totalorder %s35_s23, 0 }
   0xd   : > { %p734_p8 = por %p54_p5, %p53_p3  ;;  %p127_p10 = scmp.eq.s32.totalorder %s452_s19, 1 }
   0xe   : > { %p738_p9 = por %p121_p6, %p47_p1  ;;  %p480_p13 = scmp.lt.s32.totalorder %s655_s17, 2 }
   0xf   : > { %s743_s26 = scalar_select %p38_p7, %s643_s14, %s40_s21  }
  0x10   : > { %p745_p11 = por %p127_p10, %p53_p3  ;;  %s153_s28 = sand.u32 1, %s643_s14  }
  0x11   : > { %s455_s29 = sshll.u32 %s153_s28, 4  ;;  %s466_s30 = sshll.u32 %s651_s16, 8 }
  0x12   : > { %s839_s27 = scalar_select %p745_p11, 1, 0 }
  0x13   : > { %s165_s6 = scalar_lea.hbm %s832_s0, %s466_s30  ;;  %s157_s7 = scalar_lea.vmem [#allocation2], %s455_s29 }
  0x14   : > { %s167_s8 = sshll.u32 %s157_s7, 4  ;;  %p758_p0 = pnand %p480_p13, %p728_p4  ;;  %s168_s8 = int_to_ptr.vmem [resolvable:$true] %s167_s8 }
  0x15   : > { %p458_p1 = scmp.ge.s32.totalorder %s655_s17, 1  ;;  %p172_p2 = scmp.lt.s32.totalorder %s655_s17, 3 }
  0x16   : > { %s154_s10 = scalar_lea.sflag [#allocation3], %s153_s28  ;;  %p549_p3 = pneg %p758_p0 }
  0x17   : > { %s560_s11 = scalar_lea.vmem %s168_s8, 256  ;;  %s657_s18 = smov [#allocation2]  }
  0x18   : > { %p561_p5 = scmp.ne.s32.totalorder %s168_s8, %s560_s11  ;;  %s565_s19 = sshll.u32 %s657_s18, 4  ;;  %s566_s19 = int_to_ptr.vmem [resolvable:$false] %s565_s19 }
  0x19   : > { %s567_s21 = scalar_lea.vmem %s566_s19, 512  ;;  %p568_p10 = scmp.lt.s32.totalorder %s168_s8, %s566_s19 }
  0x1a   : > { %p563_p6 = pnand %p561_p5, %p549_p3  ;;  %p569_p12 = scmp.lt.s32.totalorder %s567_s21, %s560_s11 }
  0x1c   : > { %p564_p7 = pneg %p563_p6  ;;  %p570_p4 = por %p569_p12, %p568_p10 }
  0x1e   : > { %p571_p13 = pnand %p570_p4, %p564_p7 }
  0x20   : > { %574 = shalt.err (!%p571_p13)
}
  0x21   : > { %475 = dma.hbm_to_vmem [thread:$0]  (!%p758_p0), %s165_s6, 256, %s168_s8, %s154_s10  }
  0x22   : > { %p173_p11 = pnand %p458_p1, %p172_p2 }
  0x23   : > { %s773_s22 = sand.u32 (!%p173_p11), 1, %s639_s13  }
  0x24   : > { %176 = sbr.rel (%p173_p11) target bundleno = 207 (0xcf), region = 32  ;;  %s459_s23 = sshll.u32 (!%p173_p11), %s773_s22, 4 }
  0x25   : > { %s179_s28 = scalar_lea.sflag (!%p173_p11), [#allocation3], %s773_s22  ;;  %s777_s29 = scalar_lea.vmem (!%p173_p11), [#allocation2], %s459_s23 }
  0x29   : > { %626 = dma.done.wait (%p734_p8), %s179_s28, 256  }
  0x2a   : > { %628 = vsyncadd (%p734_p8), %s179_s28, 4294967040  ;;  %v658_v0 = vmov 1   ;;  %v659_v1 = vmov 0   ;;  %v209_v2 = vld [vmem:[%s833_s1] sm:$0xf]  ;;  %v660_v4 = vmov 2   ;;  %v221_v10 = vlaneseq }
  0x2b   : > { %539 = vset.pattern.permute.xlu1 %v658_v0  ;;  %538 = vset.pattern.permute.xlu0 %v659_v1  ;;  %v210_v3 = vld [vmem:[%s834_s2] sm:$0xf]  ;;  %v661_v5 = vmov 3   ;;  %v662_v6 = vmov 4   ;;  %v663_v7 = vmov 6   ;;  %v664_v8 = vmov 5  }
  0x2c   : > { %234 = vperm.xlu1 %539, %v209_v2   ;;  %218 = vperm.xlu0 %538, %v209_v2   ;;  %v665_v9 = vmov 7   ;;  %v222_v11 = vshrl.u32 %v221_v10, 7  ;;  %v207_v13 = vld [vmem:[%s777_s29] sm:$0xff]  ;;  %v208_v14 = vld [vmem:[%s777_s29 + $0x8] sm:$0xff]  ;;  %s460_s24 = sshll.u32 %s773_s22, 3  ;;  %s467_s7 = sshll.u32 %s647_s15, 7 }
  0x2d   : > { %s204_s8 = scalar_lea.vmem [#allocation5], %s460_s24  ;;  %s365_s18 = scalar_lea.hbm %s835_s3, %s467_s7 }
  0x2e   : > { %v223_v12 = vsub.s32 0, %v222_v11  ;;  %v239_v15 = vsub.s32 1, %v222_v11  ;;  %v255_v18 = vsub.s32 2, %v222_v11  ;;  %v271_v21 = vsub.s32 3, %v222_v11  ;;  %s367_s9 = sshll.u32 %s204_s8, 4  ;;  %s351_s19 = scalar_lea.sflag [#allocation4], %s773_s22  ;;  %s368_s9 = int_to_ptr.vmem [resolvable:$true] %s367_s9 }
  0x2f   : > { %v287_v28 = vsub.s32 4, %v222_v11  ;;  %v303_v43 = vsub.s32 5, %v222_v11  ;;  %v319_v44 = vsub.s32 6, %v222_v11  ;;  %v335_v59 = vsub.s32 7, %v222_v11  ;;  %s575_s21 = scalar_lea.vmem %s368_s9, 128  ;;  %s666_s23 = smov [#allocation5]  }
  0x30   : > { %540 = vset.pattern.permute.xlu1 %v660_v4  ;;  %213 = vperm.xlu0 %538, %v210_v3   ;;  %v224_v16 = vrot.slane %v207_v13, %v223_v12  ;;  %v228_v17 = vrot.slane %v208_v14, %v223_v12  ;;  %v240_v22 = vrot.slane %v207_v13, %v239_v15  ;;  %p576_p8 = scmp.ne.s32.totalorder %s368_s9, %s575_s21  ;;  %s579_s28 = sshll.u32 %s666_s23, 4  ;;  %s580_s28 = int_to_ptr.vmem [resolvable:$false] %s579_s28 }
  0x31   : > { %250 = vperm.xlu1 %540, %v209_v2   ;;  %v244_v23 = vrot.slane %v208_v14, %v239_v15  ;;  %v256_v26 = vrot.slane %v207_v13, %v255_v18  ;;  %v260_v27 = vrot.slane %v208_v14, %v255_v18  ;;  %v272_v30 = vrot.slane %v207_v13, %v271_v21  ;;  %s581_s15 = scalar_lea.vmem %s580_s28, 256  ;;  %p582_p0 = scmp.lt.s32.totalorder %s368_s9, %s580_s28 }
  0x32   : > { %v276_v38 = vrot.slane %v208_v14, %v271_v21  ;;  %v288_v39 = vrot.slane %v207_v13, %v287_v28  ;;  %v292_v42 = vrot.slane %v208_v14, %v287_v28  ;;  %v304_v53 = vrot.slane %v207_v13, %v303_v43  ;;  %p577_p11 = pnand %p576_p8, %p738_p9  ;;  %p583_p1 = scmp.lt.s32.totalorder %s581_s15, %s575_s21 }
  0x33   : > { %v308_v54 = vrot.slane %v208_v14, %v303_v43  ;;  %v320_v57 = vrot.slane %v207_v13, %v319_v44  ;;  %v324_v58 = vrot.slane %v208_v14, %v319_v44  ;;  %v336_v4 = vrot.slane %v207_v13, %v335_v59 }
  0x34   : > { %541 = vset.pattern.permute.xlu0 %v661_v5  ;;  %v340_v5 = vrot.slane %v208_v14, %v335_v59  ;;  %p578_p12 = pneg %p577_p11  ;;  %p584_p2 = por %p583_p1, %p582_p0 }
  0x35   : > { %542 = vset.pattern.permute.xlu1 %v662_v6  ;;  %266 = vperm.xlu0 %541, %v209_v2  }
  0x36   : > { %282 = vperm.xlu1 %542, %v209_v2   ;;  %p585_p3 = pnand %p584_p2, %p578_p12 }
  0x39   : > { %544 = vset.pattern.permute.xlu0 %v663_v7 }
  0x3a   : > { %543 = vset.pattern.permute.xlu1 %v664_v8  ;;  %314 = vperm.xlu0 %544, %v209_v2  }
  0x3b   : > { %298 = vperm.xlu1 %543, %v209_v2  }
  0x3e   : > { %546 = vset.pattern.permute.xlu0 %v665_v9 }
  0x3f   : > { %545 = vset.pattern.permute.xlu1 %v665_v9 }
  0x40   : > { %330 = vperm.xlu1 %545, %v209_v2  }
  0xa7   : > { %v235_v19 = vpop.permute.xlu1 %234  ;;  %v219_v20 = vpop.permute.xlu0 %218 }
  0xa8   : > { %v229_v24 = vmul.f32 %v224_v16, %v219_v20  ;;  %v230_v25 = vmul.f32 %v228_v17, %v219_v20  ;;  %v245_v31 = vmul.f32 %v240_v22, %v235_v19  ;;  %v246_v32 = vmul.f32 %v244_v23, %v235_v19 }
  0xab   : > { %v214_v29 = vpop.permute.xlu0 %213 }
  0xac   : > { %v231_v33 = vadd.f32 %v229_v24, %v214_v29  ;;  %v232_v34 = vadd.f32 %v230_v25, %v214_v29  ;;  %v251_v35 = vpop.permute.xlu1 %250 }
  0xad   : > { %v261_v36 = vmul.f32 %v256_v26, %v251_v35  ;;  %v262_v37 = vmul.f32 %v260_v27, %v251_v35 }
  0xae   : > { %v247_v40 = vadd.f32 %v245_v31, %v231_v33  ;;  %v248_v41 = vadd.f32 %v246_v32, %v232_v34 }
  0xb0   : > { %v263_v45 = vadd.f32 %v261_v36, %v247_v40  ;;  %v264_v46 = vadd.f32 %v262_v37, %v248_v41  ;;  %v267_v47 = vpop.permute.xlu0 %266 }
  0xb1   : > { %v277_v48 = vmul.f32 %v272_v30, %v267_v47  ;;  %v278_v49 = vmul.f32 %v276_v38, %v267_v47  ;;  %v283_v50 = vpop.permute.xlu1 %282 }
  0xb2   : > { %v293_v51 = vmul.f32 %v288_v39, %v283_v50  ;;  %v294_v52 = vmul.f32 %v292_v42, %v283_v50 }
  0xb3   : > { %v279_v55 = vadd.f32 %v277_v48, %v263_v45  ;;  %v280_v56 = vadd.f32 %v278_v49, %v264_v46 }
  0xb5   : > { %v315_v60 = vpop.permute.xlu0 %314  ;;  %v295_v61 = vadd.f32 %v293_v51, %v279_v55  ;;  %v296_v62 = vadd.f32 %v294_v52, %v280_v56 }
  0xb6   : > { %v299_v63 = vpop.permute.xlu1 %298  ;;  %v325_v2 = vmul.f32 %v320_v57, %v315_v60  ;;  %v326_v3 = vmul.f32 %v324_v58, %v315_v60 }
  0xb7   : > { %v309_v0 = vmul.f32 %v304_v53, %v299_v63  ;;  %v310_v1 = vmul.f32 %v308_v54, %v299_v63 }
  0xb9   : > { %v311_v6 = vadd.f32 %v309_v0, %v295_v61  ;;  %v312_v7 = vadd.f32 %v310_v1, %v296_v62 }
  0xbb   : > { %v327_v8 = vadd.f32 %v325_v2, %v311_v6  ;;  %v328_v9 = vadd.f32 %v326_v3, %v312_v7  ;;  %v331_v10 = vpop.permute.xlu1 %330 }
  0xbc   : > { %v341_v11 = vmul.f32 %v336_v4, %v331_v10  ;;  %v342_v12 = vmul.f32 %v340_v5, %v331_v10 }
  0xbe   : > { %v343_v15 = vadd.f32 %v341_v11, %v327_v8  ;;  %v344_v16 = vadd.f32 %v342_v12, %v328_v9 }
  0xc0   : > { %v347_v17 = vcombine.low %v343_v15, %v344_v16 }
  0xc2   : > { %349 = vst [vmem:[%s204_s8] sm:$0xff] %v347_v17 }
  0xc3   : > { %588 = shalt.err (!%p585_p3)
}
  0xc4   : > { %s589_s29 = scalar_lea.hbm %s365_s18, 128  ;;  %s593_s4 = scalar_lea.hbm %s835_s3, 256 }
  0xc5   : > { %p590_p5 = scmp.ne.s32.totalorder %s365_s18, %s589_s29  ;;  %p594_p10 = scmp.lt.s32.totalorder %s365_s18, %s835_s3 }
  0xc6   : > { %p595_p4 = scmp.lt.s32.totalorder %s593_s4, %s589_s29 }
  0xc7   : > { %p591_p6 = pnand %p590_p5, %p738_p9 }
  0xc8   : > { %p596_p13 = por %p595_p4, %p594_p10 }
  0xc9   : > { %p592_p7 = pneg %p591_p6 }
  0xcb   : > { %p597_p8 = pnand %p596_p13, %p592_p7 }
  0xcd   : > { %600 = shalt.err (!%p597_p8)
}
  0xce   : > { %470 = dma.vmem_to_hbm [thread:$0]  (%p738_p9), %s368_s9, 128, %s365_s18, %s351_s19  }
  0xcf PF: > { %s379_s24 = sand.u32 1, %s635_s12   ;;  %p841_p11 = scmp.ne.s32.totalorder %s839_s27, 0 }
  0xd0   : > { %p842_p12 = scmp.ge.s32.totalorder %s655_s17, 2  ;;  %s380_s7 = scalar_lea.sflag [#allocation4], %s379_s24 }
  0xd2   : > { %p477_p0 = pnand %p842_p12, %p841_p11 }
  0xd4   : > { %p478_p1 = pneg %p477_p0 }
  0xd6   : > { %630 = dma.done.wait (%p478_p1), %s380_s7, 128  }
  0xd7   : > { %632 = vsyncadd (%p478_p1), %s380_s7, 4294967168  ;;  %s19_s17 = sadd.s32 1, %s655_s17   ;;  %s843_s12 = smov %s639_s13 }
  0xd8   : > { %p16_p2 = scmp.ge.s32.totalorder %s19_s17, 4   ;;  %s844_s13 = smov %s643_s14 }
  0xd9   : > { %s845_s14 = smov %s743_s26  ;;  %s846_s15 = smov %s651_s16 }
  0xda   : > { %s847_s16 = smov %s849_s20  ;;  %18 = sbr.rel (!%p16_p2) target bundleno = 6 (0x6), region = 77 }
  0xdf   :  { %385 = vsyncpa [#allocation3], 1 }
  0xe0   :  { %387 = vsyncpa [#allocation3 + $0x1], 1 }
  0xe1   :  { %388 = vsyncpa [#allocation4], 1 }
  0xe2   :  { %390 = vsyncpa [#allocation4 + $0x1], 1 }

</bundles_post_ra>
